<compile_context>
chip_gen: v7x
topology: tpu7x:2x2x1
jax: 0.10.0
libtpu: 0.0.40
codegen_flags: <defaults>
</compile_context>

<pallas_src>
import jax
import jax.numpy as jnp
from jax.experimental import pallas as pl
from jax.experimental.pallas import tpu as pltpu  # noqa: F401  (TPU backend)

BN_EPS = 1e-5
LANE = 128


def _round_up(x, m):
    return ((x + m - 1) // m) * m


def _full_spec(shape):
    # Whole-array block; grid is empty so index_map takes no arguments.
    return pl.BlockSpec(shape, lambda: tuple(0 for _ in shape))


# ---------------------------------------------------------------------------
# Fused kernel: x -> [Linear -> BN(batch stats) -> ReLU]*H -> Linear(no bias)
# refs layout: x, (w, gamma_beta) * num_hidden, w_final, out
# ---------------------------------------------------------------------------
def make_projector_kernel(num_hidden, mxu_dtype):
    def kernel(*refs):
        x_ref = refs[0]
        o_ref = refs[-1]

        h = x_ref[...].astype(mxu_dtype)
        idx = 1
        for _ in range(num_hidden):
            w_ref = refs[idx]
            gb_ref = refs[idx + 1]
            idx += 2

            # Linear (no bias: cancelled by BN mean subtraction), f32 accumulate.
            # Weights are already stored in mxu_dtype -> no in-kernel weight cast.
            y = jnp.dot(h, w_ref[...], preferred_element_type=jnp.float32)

            # BatchNorm1d, training-mode batch stats (biased variance),
            # centered two-pass variance for f32 robustness, folded affine + ReLU.
            mean = jnp.mean(y, axis=0, keepdims=True)
            cent = y - mean
            var = jnp.mean(cent * cent, axis=0, keepdims=True)
            gamma = gb_ref[0:1, :]
            beta = gb_ref[1:2, :]
            scale = gamma * jax.lax.rsqrt(var + BN_EPS)   # per-feature, EUP rsqrt
            h = jnp.maximum(cent * scale + beta, 0.0).astype(mxu_dtype)

        # Final Linear, bias=False; output written un-padded.
        wf_ref = refs[idx]
        o_ref[...] = jnp.dot(
            h, wf_ref[...], preferred_element_type=jnp.float32
        ).astype(o_ref.dtype)

    return kernel


# ---------------------------------------------------------------------------
# One-time parameter packing: pad hidden output dims to 128 lanes, pack
# gamma/beta into one (2, Dout_p) tensor per layer, optionally pre-cast weights
# to bf16 for the MXU.  Call this ONCE; reuse the result for every forward.
# ---------------------------------------------------------------------------
def pack_projector_params(params, use_bf16_mxu=False):
    mxu_dtype = jnp.bfloat16 if use_bf16_mxu else jnp.float32

    hidden_w, gbs = [], []
    prev = None
    d_in = None
    for p in params[:-1]:
        _, w, gamma, beta = p
        din, dout = w.shape
        if prev is None:
            d_in = din
            prev = din                       # first weight keeps true K = d_in
        dout_p = _round_up(dout, LANE)
        w_p = jnp.zeros((prev, dout_p), jnp.float32).at[:din, :dout].set(w)
        gb = (
            jnp.zeros((2, dout_p), jnp.float32)
            .at[0, :dout].set(gamma)
            .at[1, :dout].set(beta)
        )
        hidden_w.append(w_p.astype(mxu_dtype))
        gbs.append(gb)
        prev = dout_p

    _, wf = params[-1]
    din, dout_final = wf.shape
    if prev is None:
        d_in = din
        prev = din
    wf_p = jnp.zeros((prev, dout_final), jnp.float32).at[:din, :dout_final].set(wf)
    wf_p = wf_p.astype(mxu_dtype)

    return {
        "num_hidden": len(params) - 1,
        "mxu_dtype": mxu_dtype,
        "hidden_w": hidden_w,
        "gbs": gbs,
        "final_w": wf_p,
        "d_in": d_in,
        "d_out": dout_final,
    }


# ---------------------------------------------------------------------------
# Forward: one pallas_call, no per-call padding/slicing anywhere.
# ---------------------------------------------------------------------------
def projector_forward(packed, x):
    n, d_in = x.shape
    assert d_in == packed["d_in"], "input feature dim mismatch"
    num_hidden = packed["num_hidden"]
    d_out = packed["d_out"]

    inputs = [x]
    in_specs = [_full_spec((n, d_in))]

    flops = 0
    transcendentals = 0
    bytes_accessed = x.size * x.dtype.itemsize + n * d_out * 4

    for w, gb in zip(packed["hidden_w"], packed["gbs"]):
        inputs += [w, gb]
        in_specs += [_full_spec(w.shape), _full_spec(gb.shape)]
        kk, nn_ = w.shape
        flops += 2 * n * kk * nn_ + 8 * n * nn_          # matmul + BN/ReLU passes
        transcendentals += nn_                           # per-feature rsqrt
        bytes_accessed += w.size * w.dtype.itemsize + gb.size * gb.dtype.itemsize

    wf = packed["final_w"]
    inputs.append(wf)
    in_specs.append(_full_spec(wf.shape))
    kk, nn_ = wf.shape
    flops += 2 * n * kk * nn_
    bytes_accessed += wf.size * wf.dtype.itemsize

    return pl.pallas_call(
        make_projector_kernel(num_hidden, packed["mxu_dtype"]),
        out_shape=jax.ShapeDtypeStruct((n, d_out), jnp.float32),
        in_specs=in_specs,
        out_specs=_full_spec((n, d_out)),
        cost_estimate=pl.CostEstimate(
            flops=int(flops),
            transcendentals=int(transcendentals),
            bytes_accessed=int(bytes_accessed),
        ),
    )(*inputs)


# ---------------------------------------------------------------------------
# Parameter construction (mirrors nn.Linear / nn.BatchNorm1d defaults).
# Hidden Linear bias is omitted: it is cancelled exactly by the batch-mean
# subtraction of the following training-mode BatchNorm1d.
# TODO(synk): eval-mode BatchNorm (running_mean/running_var) is not implemented;
#             in that mode the hidden bias is NOT a no-op and must be added back.
# ---------------------------------------------------------------------------
def init_projector_params(layers_dims, key):
    params = []
    for i in range(len(layers_dims) - 2):
        din, dout = layers_dims[i], layers_dims[i + 1]
        key, kw = jax.random.split(key)
        bound = 1.0 / jnp.sqrt(din)
        w = jax.random.uniform(kw, (din, dout), jnp.float32, -bound, bound)
        gamma = jnp.ones((dout,), jnp.float32)
        beta = jnp.zeros((dout,), jnp.float32)
        params.append(("hidden", w, gamma, beta))
    din, dout = layers_dims[-2], layers_dims[-1]
    key, kw = jax.random.split(key)
    bound = 1.0 / jnp.sqrt(din)
    w = jax.random.uniform(kw, (din, dout), jnp.float32, -bound, bound)
    params.append(("final", w))
    return params


# ---------------------------------------------------------------------------
# Pure-JAX reference (PyTorch training-mode semantics) for sanity checking.
# ---------------------------------------------------------------------------
def projector_reference(params, x):
    for p in params:
        if p[0] == "hidden":
            _, w, gamma, beta = p
            y = x @ w
            mean = jnp.mean(y, axis=0, keepdims=True)
            var = jnp.mean((y - mean) ** 2, axis=0, keepdims=True)
            y = (y - mean) / jnp.sqrt(var + BN_EPS) * gamma + beta
            x = jnp.maximum(y, 0.0)
        else:
            x = x @ p[1]
    return x


if __name__ == "__main__":
    layers_dims = [16, 32, 32, 8]  # e.g. Projector([16, 32, 32, 8])
    batch = 8                      # multiple of 8 sublanes

    key = jax.random.PRNGKey(0)
    key, kx = jax.random.split(key)
    x = jax.random.normal(kx, (batch, layers_dims[0]), jnp.float32)

    params = init_projector_params(layers_dims, key)

    # f32 MXU path: bit-level parity check vs the reference.
    packed_f32 = pack_projector_params(params, use_bf16_mxu=False)
    out = jax.block_until_ready(projector_forward(packed_f32, x))
    ref = projector_reference(params, x)
    assert out.shape == (batch, layers_dims[-1])
    assert jnp.allclose(out, ref, atol=1e-4, rtol=1e-4), "mismatch vs reference (f32)"

    # bf16-weight MXU path (recommended default on v5e/v6e/v7x): exercise it and
    # sanity-check it stays close (BN renormalizes, so precision loss is benign).
    packed_bf16 = pack_projector_params(params, use_bf16_mxu=True)
    out_bf16 = jax.block_until_ready(projector_forward(packed_bf16, x))
    assert out_bf16.shape == (batch, layers_dims[-1])
    assert bool(jnp.all(jnp.isfinite(out_bf16)))
    assert float(jnp.max(jnp.abs(out_bf16 - ref))) < 0.25, "bf16 path drifted too far"

    print("KERNEL_OK")
</pallas_src>

<mosaic_0001>
module attributes {stable_mosaic.version = 11 : i64} {
  func.func @kernel(%arg0: memref<8x16xf32, #tpu.memory_space<vmem>>, %arg1: memref<16x128xf32, #tpu.memory_space<vmem>>, %arg2: memref<2x128xf32, #tpu.memory_space<vmem>>, %arg3: memref<128x128xf32, #tpu.memory_space<vmem>>, %arg4: memref<2x128xf32, #tpu.memory_space<vmem>>, %arg5: memref<128x8xf32, #tpu.memory_space<vmem>>, %arg6: memref<8x8xf32, #tpu.memory_space<vmem>>) attributes {dimension_semantics = [], scalar_prefetch = 0 : i64, scratch_operands = 0 : i64, tpu.core_type = #tpu.core_type<tc>} {
    %c0 = arith.constant 0 : index
    %c0_0 = arith.constant 0 : index
    %0 = vector.load %arg0[%c0, %c0_0] : memref<8x16xf32, #tpu.memory_space<vmem>>, vector<8x16xf32>
    %c0_1 = arith.constant 0 : index
    %c0_2 = arith.constant 0 : index
    %1 = vector.load %arg1[%c0_1, %c0_2] : memref<16x128xf32, #tpu.memory_space<vmem>>, vector<16x128xf32>
    %cst = arith.constant dense<0.000000e+00> : vector<8x128xf32>
    %2 = tpu.matmul %0, %1, %cst {dimension_numbers = #tpu.dot_dimension_numbers<[1], [0], [0], [1], [0, 0, 1, 1], [], []>} : vector<8x16xf32>, vector<16x128xf32>, vector<8x128xf32> -> vector<8x128xf32>
    %cst_3 = arith.constant dense<0.000000e+00> : vector<128xf32>
    %3 = vector.multi_reduction <add>, %2, %cst_3 [0] : vector<8x128xf32> to vector<128xf32>
    %4 = vector.shape_cast %3 : vector<128xf32> to vector<1x128xf32>
    %cst_4 = arith.constant 8.000000e+00 : f32
    %5 = vector.broadcast %cst_4 : f32 to vector<1x128xf32>
    %6 = arith.divf %4, %5 : vector<1x128xf32>
    %7 = vector.broadcast %6 : vector<1x128xf32> to vector<8x128xf32>
    %8 = arith.subf %2, %7 : vector<8x128xf32>
    %9 = arith.mulf %8, %8 : vector<8x128xf32>
    %cst_5 = arith.constant dense<0.000000e+00> : vector<128xf32>
    %10 = vector.multi_reduction <add>, %9, %cst_5 [0] : vector<8x128xf32> to vector<128xf32>
    %11 = vector.shape_cast %10 : vector<128xf32> to vector<1x128xf32>
    %cst_6 = arith.constant 8.000000e+00 : f32
    %12 = vector.broadcast %cst_6 : f32 to vector<1x128xf32>
    %13 = arith.divf %11, %12 : vector<1x128xf32>
    %c0_7 = arith.constant 0 : index
    %c0_8 = arith.constant 0 : index
    %14 = vector.load %arg2[%c0_7, %c0_8] : memref<2x128xf32, #tpu.memory_space<vmem>>, vector<1x128xf32>
    %c1 = arith.constant 1 : index
    %c0_9 = arith.constant 0 : index
    %15 = vector.load %arg2[%c1, %c0_9] : memref<2x128xf32, #tpu.memory_space<vmem>>, vector<1x128xf32>
    %cst_10 = arith.constant 9.99999974E-6 : f32
    %16 = vector.broadcast %cst_10 : f32 to vector<1x128xf32>
    %17 = arith.addf %13, %16 : vector<1x128xf32>
    %18 = math.rsqrt %17 : vector<1x128xf32>
    %19 = arith.mulf %14, %18 : vector<1x128xf32>
    %20 = vector.broadcast %19 : vector<1x128xf32> to vector<8x128xf32>
    %21 = arith.mulf %8, %20 : vector<8x128xf32>
    %22 = vector.broadcast %15 : vector<1x128xf32> to vector<8x128xf32>
    %23 = arith.addf %21, %22 : vector<8x128xf32>
    %cst_11 = arith.constant 0.000000e+00 : f32
    %24 = vector.broadcast %cst_11 : f32 to vector<8x128xf32>
    %25 = arith.maximumf %23, %24 : vector<8x128xf32>
    %c0_12 = arith.constant 0 : index
    %c0_13 = arith.constant 0 : index
    %26 = vector.load %arg3[%c0_12, %c0_13] : memref<128x128xf32, #tpu.memory_space<vmem>>, vector<128x128xf32>
    %cst_14 = arith.constant dense<0.000000e+00> : vector<8x128xf32>
    %27 = tpu.matmul %25, %26, %cst_14 {dimension_numbers = #tpu.dot_dimension_numbers<[1], [0], [0], [1], [0, 0, 1, 1], [], []>} : vector<8x128xf32>, vector<128x128xf32>, vector<8x128xf32> -> vector<8x128xf32>
    %cst_15 = arith.constant dense<0.000000e+00> : vector<128xf32>
    %28 = vector.multi_reduction <add>, %27, %cst_15 [0] : vector<8x128xf32> to vector<128xf32>
    %29 = vector.shape_cast %28 : vector<128xf32> to vector<1x128xf32>
    %cst_16 = arith.constant 8.000000e+00 : f32
    %30 = vector.broadcast %cst_16 : f32 to vector<1x128xf32>
    %31 = arith.divf %29, %30 : vector<1x128xf32>
    %32 = vector.broadcast %31 : vector<1x128xf32> to vector<8x128xf32>
    %33 = arith.subf %27, %32 : vector<8x128xf32>
    %34 = arith.mulf %33, %33 : vector<8x128xf32>
    %cst_17 = arith.constant dense<0.000000e+00> : vector<128xf32>
    %35 = vector.multi_reduction <add>, %34, %cst_17 [0] : vector<8x128xf32> to vector<128xf32>
    %36 = vector.shape_cast %35 : vector<128xf32> to vector<1x128xf32>
    %cst_18 = arith.constant 8.000000e+00 : f32
    %37 = vector.broadcast %cst_18 : f32 to vector<1x128xf32>
    %38 = arith.divf %36, %37 : vector<1x128xf32>
    %c0_19 = arith.constant 0 : index
    %c0_20 = arith.constant 0 : index
    %39 = vector.load %arg4[%c0_19, %c0_20] : memref<2x128xf32, #tpu.memory_space<vmem>>, vector<1x128xf32>
    %c1_21 = arith.constant 1 : index
    %c0_22 = arith.constant 0 : index
    %40 = vector.load %arg4[%c1_21, %c0_22] : memref<2x128xf32, #tpu.memory_space<vmem>>, vector<1x128xf32>
    %cst_23 = arith.constant 9.99999974E-6 : f32
    %41 = vector.broadcast %cst_23 : f32 to vector<1x128xf32>
    %42 = arith.addf %38, %41 : vector<1x128xf32>
    %43 = math.rsqrt %42 : vector<1x128xf32>
    %44 = arith.mulf %39, %43 : vector<1x128xf32>
    %45 = vector.broadcast %44 : vector<1x128xf32> to vector<8x128xf32>
    %46 = arith.mulf %33, %45 : vector<8x128xf32>
    %47 = vector.broadcast %40 : vector<1x128xf32> to vector<8x128xf32>
    %48 = arith.addf %46, %47 : vector<8x128xf32>
    %cst_24 = arith.constant 0.000000e+00 : f32
    %49 = vector.broadcast %cst_24 : f32 to vector<8x128xf32>
    %50 = arith.maximumf %48, %49 : vector<8x128xf32>
    %c0_25 = arith.constant 0 : index
    %c0_26 = arith.constant 0 : index
    %51 = vector.load %arg5[%c0_25, %c0_26] : memref<128x8xf32, #tpu.memory_space<vmem>>, vector<128x8xf32>
    %cst_27 = arith.constant dense<0.000000e+00> : vector<8x8xf32>
    %52 = tpu.matmul %50, %51, %cst_27 {dimension_numbers = #tpu.dot_dimension_numbers<[1], [0], [0], [1], [0, 0, 1, 1], [], []>} : vector<8x128xf32>, vector<128x8xf32>, vector<8x8xf32> -> vector<8x8xf32>
    %c0_28 = arith.constant 0 : index
    %c0_29 = arith.constant 0 : index
    %53 = vector.load %arg6[%c0_28, %c0_29] : memref<8x8xf32, #tpu.memory_space<vmem>>, vector<8x8xf32>
    tpu.vector_store %arg6[%c0_28, %c0_29], %52 {strides = array<i32>} : memref<8x8xf32, #tpu.memory_space<vmem>>, vector<8x8xf32>,
    return
  }
}

</mosaic_0001>

<bundles_post_ra>
// kernel: tpu_custom_call.1
= control target key start
LH: loop header
LB: loop body
LE: loop exit
PB: predicated region body
PF: predicated region fallthrough
CT: control target
= control target key end

     0   :  { %11 = vsyncpa [#allocation3], 0  ;;  %s839_s0 = inlined_call_operand.hbm [shape: f32[8,16], index: 0, kind: input, shape index: {}]   ;;  %s840_s1 = inlined_call_operand.vmem [shape: f32[16,128], index: 1, kind: input, shape index: {}]   ;;  %s841_s2 = inlined_call_operand.vmem [shape: f32[2,128], index: 2, kind: input, shape index: {}]   ;;  %s842_s3 = inlined_call_operand.vmem [shape: f32[128,128], index: 3, kind: input, shape index: {}]   ;;  %s843_s4 = inlined_call_operand.hbm [shape: f32[2,128], index: 4, kind: input, shape index: {}]   ;;  %s844_s5 = inlined_call_operand.vmem [shape: f32[128,8], index: 5, kind: input, shape index: {}]   ;;  %s845_s6 = inlined_call_operand.hbm [shape: f32[8,8], index: 6, kind: output, shape index: {}]  }
   0x1   :  { %12 = vsyncpa [#allocation6], 0 }
   0x2   :  { %13 = vsyncpa [#allocation4], 0  ;;  %s630_s21 = smov [#allocation2]   ;;  %s631_s23 = smov [#allocation5]  }
   0x3   :  { %s20_s22 = sshll.u32 %s630_s21, 4  ;;  %s36_s24 = sshll.u32 %s631_s23, 4  ;;  %s21_s22 = int_to_ptr.vmem [resolvable:$true] %s20_s22  ;;  %s37_s24 = int_to_ptr.vmem [resolvable:$true] %s36_s24 }
   0x4   :  { %s558_s27 = scalar_lea.hbm %s839_s0, 128 }
   0x5   :  { %p559_p0 = scmp.ne.s32.totalorder %s839_s0, %s558_s27  ;;  %p562_p1 = scmp.lt.u32.totalorder %s558_s27, %s839_s0 }
   0x7   :  { %p564_p2 = pnand %p562_p1, %p559_p0 }
   0x9   :  { %567 = shalt.err (!%p564_p2)
}
   0xa   :  { %s568_s8 = scalar_lea.vmem %s21_s22, 128  ;;  %p573_p4 = scmp.lt.s32.totalorder %s21_s22, %s21_s22 }
   0xb   :  { %p569_p3 = scmp.ne.s32.totalorder %s21_s22, %s568_s8  ;;  %p574_p5 = scmp.lt.s32.totalorder %s568_s8, %s568_s8 }
   0xd   :  { %p575_p6 = por %p574_p5, %p573_p4 }
   0xf   :  { %p576_p7 = pnand %p575_p6, %p569_p3 }
  0x11   :  { %579 = shalt.err (!%p576_p7)
}
  0x12   :  { %23 = dma.hbm_to_vmem [thread:$0]  %s839_s0, 128, %s21_s22, [#allocation3]  }
  0x13   :  { %s580_s13 = scalar_lea.hbm %s843_s4, 32 }
  0x14   :  { %p581_p8 = scmp.ne.s32.totalorder %s843_s4, %s580_s13  ;;  %p584_p9 = scmp.lt.u32.totalorder %s580_s13, %s843_s4 }
  0x16   :  { %p586_p10 = pnand %p584_p9, %p581_p8 }
  0x18   :  { %589 = shalt.err (!%p586_p10)
}
  0x19   :  { %s590_s18 = scalar_lea.vmem %s37_s24, 32  ;;  %p595_p12 = scmp.lt.s32.totalorder %s37_s24, %s37_s24 }
  0x1a   :  { %p591_p11 = scmp.ne.s32.totalorder %s37_s24, %s590_s18  ;;  %p596_p13 = scmp.lt.s32.totalorder %s590_s18, %s590_s18 }
  0x1c   :  { %p597_p0 = por %p596_p13, %p595_p12 }
  0x1e   :  { %p598_p1 = pnand %p597_p0, %p591_p11 }
  0x20   :  { %601 = shalt.err (!%p598_p1)
}
  0x21   :  { %39 = dma.hbm_to_vmem [thread:$0]  %s843_s4, 32, %s37_s24, [#allocation6]  }
  0x22   :  { %624 = dma.done.wait [#allocation3], 128  }
  0x23   :  { %625 = vsyncadd [#allocation3], 4294967168 }
  0x24   :  { %626 = dma.done.wait [#allocation6], 32  }
  0x25   :  { %627 = vsyncadd [#allocation6], 4294967264  ;;  %v632_v0 = vmov 0.0|0.0   ;;  %vm633_vm0 = vmmov 0   ;;  %v634_v1 = vmov 0.0   ;;  %v49_v2 = vld [vmem:[%s840_s1] sm:$0xff]  ;;  %v147_v49 = vlaneseq }
  0x26   :  { %497 = vmatprep.subr.bf16.mxu0 %v632_v0  ;;  %424 = vmatprep.mubr.msk.f32.mxu0 %vm633_vm0, %v634_v1  ;;  %v50_v3 = vld [vmem:[%s840_s1 + $0x8] sm:$0xff]  ;;  %v48_v5 = vld [vmem:[#allocation2] sm:$0xff]  ;;  %vm51_vm1 = vcmask 130048   ;;  %v160_v9 = vld [vmem:[%s842_s3 + $0x10] sm:$0xff]  ;;  %vm362_vm2 = vcmask 64512  }
  0x27   :  { %500 = vmatprep.subr.bf16.mxu1 %v632_v0  ;;  %459 = vmatprep.mubr.msk.f32.mxu1 %vm633_vm0, %v634_v1  ;;  %v498_v4 = vpack.c.bf16 %v50_v3, %v49_v2  ;;  %v158_v6 = vld [vmem:[%s842_s3] sm:$0xff]  ;;  %v159_v7 = vld [vmem:[%s842_s3 + $0x8] sm:$0xff]  ;;  %v161_v10 = vld [vmem:[%s842_s3 + $0x18] sm:$0xff]  ;;  %v759_v50 = vshrl.u32 %v147_v49, 7 }
  0x28   :  { %v501_v8 = vpack.c.bf16 %v159_v7, %v158_v6  ;;  %v504_v11 = vpack.c.bf16 %v161_v10, %v160_v9  ;;  %v162_v12 = vld [vmem:[%s842_s3 + $0x20] sm:$0xff]  ;;  %v163_v13 = vld [vmem:[%s842_s3 + $0x28] sm:$0xff]  ;;  %v164_v15 = vld [vmem:[%s842_s3 + $0x30] sm:$0xff] }
  0x29   :  { %499 = vmatpush3.bf16.msra.mxu0 %v498_v4  ;;  %v507_v14 = vpack.c.bf16 %v163_v13, %v162_v12  ;;  %v165_v16 = vld [vmem:[%s842_s3 + $0x38] sm:$0xff]  ;;  %v166_v18 = vld [vmem:[%s842_s3 + $0x40] sm:$0xff]  ;;  %v167_v19 = vld [vmem:[%s842_s3 + $0x48] sm:$0xff]  ;;  %v149_v52 = vsub.s32 0, %v759_v50 }
  0x2a   :  { %524 = vmatprep.subr.bf16.mxu0 %v632_v0  ;;  %502 = vmatpush3.bf16.msra.mxu1 %v501_v8  ;;  %v510_v17 = vpack.c.bf16 %v165_v16, %v164_v15  ;;  %v513_v20 = vpack.c.bf16 %v167_v19, %v166_v18  ;;  %v168_v21 = vld [vmem:[%s842_s3 + $0x50] sm:$0xff]  ;;  %v169_v22 = vld [vmem:[%s842_s3 + $0x58] sm:$0xff]  ;;  %v170_v24 = vld [vmem:[%s842_s3 + $0x60] sm:$0xff] }
  0x2b   :  { %503 = vmatprep.subr.bf16.mxu1 %v632_v0  ;;  %v516_v23 = vpack.c.bf16 %v169_v22, %v168_v21  ;;  %v171_v25 = vld [vmem:[%s842_s3 + $0x68] sm:$0xff]  ;;  %v172_v27 = vld [vmem:[%s842_s3 + $0x70] sm:$0xff]  ;;  %v173_v28 = vld [vmem:[%s842_s3 + $0x78] sm:$0xff] }
  0x2c   :  { %425 = vmatmul.mubr.msk.f32.vlgmr.msra.gmra.mrb[0].mxu0 %vm51_vm1, %v48_v5  ;;  %v519_v26 = vpack.c.bf16 %v171_v25, %v170_v24  ;;  %v522_v29 = vpack.c.bf16 %v173_v28, %v172_v27  ;;  %v142_v51 = vld [vmem:[%s841_s2] sm:$0x1]  ;;  %v381_v56 = vld [vmem:[%s841_s2 + $0x1] ss:$0 sm:$0xff]  ;;  %v277_v61 = vld [vmem:[%s844_s5 + $0x8] sm:$0xff] }
  0x2d   :  { %494 = vmatprep.mubr.msk.f32.mxu0 %vm633_vm0, %v634_v1  ;;  %v276_v60 = vld [vmem:[%s844_s5] sm:$0xff]  ;;  %v278_v63 = vld [vmem:[%s844_s5 + $0x10] sm:$0xff]  ;;  %v279_v1 = vld [vmem:[%s844_s5 + $0x18] sm:$0xff] }
  0x2e   :  { %505 = vmatpush3.bf16.msra.mxu1 %v504_v11  ;;  %v525_v62 = vpack.c.bf16 %v277_v61, %v276_v60  ;;  %v528_v2 = vpack.c.bf16 %v279_v1, %v278_v63  ;;  %v280_v3 = vld [vmem:[%s844_s5 + $0x20] sm:$0xff]  ;;  %v281_v4 = vld [vmem:[%s844_s5 + $0x28] sm:$0xff]  ;;  %v282_v6 = vld [vmem:[%s844_s5 + $0x30] sm:$0xff] }
  0x2f   :  { %506 = vmatprep.subr.bf16.mxu1 %v632_v0  ;;  %v531_v5 = vpack.c.bf16 %v281_v4, %v280_v3  ;;  %v283_v7 = vld [vmem:[%s844_s5 + $0x38] sm:$0xff]  ;;  %v284_v9 = vld [vmem:[%s844_s5 + $0x40] sm:$0xff]  ;;  %v285_v10 = vld [vmem:[%s844_s5 + $0x48] sm:$0xff] }
  0x30   :  { %526 = vmatpush3.bf16.msra.mxu0 %v525_v62  ;;  %v534_v8 = vpack.c.bf16 %v283_v7, %v282_v6  ;;  %v537_v11 = vpack.c.bf16 %v285_v10, %v284_v9  ;;  %v286_v12 = vld [vmem:[%s844_s5 + $0x50] sm:$0xff]  ;;  %v287_v13 = vld [vmem:[%s844_s5 + $0x58] sm:$0xff]  ;;  %v288_v15 = vld [vmem:[%s844_s5 + $0x60] sm:$0xff] }
  0x31   :  { %527 = vmatprep.subr.bf16.mxu0 %v632_v0  ;;  %v289_v16 = vld [vmem:[%s844_s5 + $0x68] sm:$0xff]  ;;  %v290_v18 = vld [vmem:[%s844_s5 + $0x70] sm:$0xff]  ;;  %v291_v19 = vld [vmem:[%s844_s5 + $0x78] sm:$0xff]  ;;  %s635_s5 = smov [#allocation7]  }
  0x32   :  { %508 = vmatpush3.bf16.msra.mxu1 %v507_v14  ;;  %v540_v14 = vpack.c.bf16 %v287_v13, %v286_v12  ;;  %s370_s9 = sshll.u32 %s635_s5, 4  ;;  %s371_s9 = int_to_ptr.vmem [resolvable:$true] %s370_s9 }
  0x33   :  { %509 = vmatprep.subr.bf16.mxu1 %v632_v0  ;;  %s602_s10 = scalar_lea.vmem %s371_s9, 128  ;;  %p607_p3 = scmp.lt.s32.totalorder %s371_s9, %s371_s9 }
  0x34   :  { %529 = vmatpush3.bf16.msra.mxu0 %v528_v2  ;;  %p603_p2 = scmp.ne.s32.totalorder %s371_s9, %s602_s10  ;;  %p608_p4 = scmp.lt.s32.totalorder %s602_s10, %s602_s10 }
  0x35   :  { %530 = vmatprep.subr.bf16.mxu0 %v632_v0 }
  0x36   :  { %511 = vmatpush3.bf16.msra.mxu1 %v510_v17  ;;  %v543_v17 = vpack.c.bf16 %v289_v16, %v288_v15  ;;  %p609_p5 = por %p608_p4, %p607_p3 }
  0x37   :  { %512 = vmatprep.subr.bf16.mxu1 %v632_v0 }
  0x38   :  { %532 = vmatpush3.bf16.msra.mxu0 %v531_v5  ;;  %p610_p6 = pnand %p609_p5, %p603_p2 }
  0x39   :  { %533 = vmatprep.subr.bf16.mxu0 %v632_v0 }
  0x3a   :  { %514 = vmatpush3.bf16.msra.mxu1 %v513_v20  ;;  %v546_v20 = vpack.c.bf16 %v291_v19, %v290_v18 }
  0x3b   :  { %515 = vmatprep.subr.bf16.mxu1 %v632_v0 }
  0x3c   :  { %535 = vmatpush3.bf16.msra.mxu0 %v534_v8 }
  0x3d   :  { %536 = vmatprep.subr.bf16.mxu0 %v632_v0 }
  0x3e   :  { %517 = vmatpush3.bf16.msra.mxu1 %v516_v23 }
  0x3f   :  { %518 = vmatprep.subr.bf16.mxu1 %v632_v0 }
  0x40   :  { %538 = vmatpush3.bf16.msra.mxu0 %v537_v11 }
  0x41   :  { %539 = vmatprep.subr.bf16.mxu0 %v632_v0 }
  0x42   :  { %520 = vmatpush3.bf16.msra.mxu1 %v519_v26 }
  0x43   :  { %521 = vmatprep.subr.bf16.mxu1 %v632_v0 }
  0x44   :  { %541 = vmatpush3.bf16.msra.mxu0 %v540_v14 }
  0x45   :  { %542 = vmatprep.subr.bf16.mxu0 %v632_v0 }
  0x46   :  { %523 = vmatpush3.bf16.msra.mxu1 %v522_v29 }
  0x48   :  { %544 = vmatpush3.bf16.msra.mxu0 %v543_v17 }
  0x49   :  { %545 = vmatprep.subr.bf16.mxu0 %v632_v0 }
  0x4c   :  { %547 = vmatpush3.bf16.msra.mxu0 %v546_v20 }
  0xff   :  { %v121_v30 = vpop.f32.mrb[0].mxu0 }
 0x100   :  { %v125_v31 = vrot.slane %v121_v30, 4  ;;  %v426_v32 = vpop.f32.mrb[1].mxu0 }
 0x102   :  { %v126_v33 = vadd.f32 %v125_v31, %v121_v30 }
 0x104   :  { %v127_v34 = vrot.slane %v126_v33, 2 }
 0x106   :  { %v128_v35 = vadd.f32 %v127_v34, %v126_v33 }
 0x108   :  { %v129_v36 = vrot.slane %v128_v35, 1 }
 0x10a   :  { %v130_v37 = vadd.f32 %v129_v36, %v128_v35 }
 0x10c   :  { %v132_v38 = vmul.f32 0.125, %v130_v37 }
 0x10e   :  { %v133_v39 = vsub.f32 %v121_v30, %v132_v38 }
 0x110   :  { %v134_v40 = vmul.f32 %v133_v39, %v133_v39 }
 0x112   :  { %v135_v41 = vrot.slane %v134_v40, 4 }
 0x114   :  { %v136_v42 = vadd.f32 %v135_v41, %v134_v40 }
 0x116   :  { %v137_v43 = vrot.slane %v136_v42, 2 }
 0x118   :  { %v138_v44 = vadd.f32 %v137_v43, %v136_v42  ;;  %v382_v43 = vld [vmem:[#allocation5 + $0x1] ss:$0 sm:$0xff] }
 0x11a   :  { %v139_v45 = vrot.slane %v138_v44, 1 }
 0x11c   :  { %v140_v46 = vadd.f32 %v139_v45, %v138_v44 }
 0x11e   :  { %v141_v47 = vmul.f32 0.125, %v140_v46 }
 0x120   :  { %v144_v48 = vadd.f32 1e-05, %v141_v47 }
 0x122   :  { %554 = vrsqrt.f32 %v144_v48 }
 0x12c   :  { %v555_v53 = vpop.eup %554 }
 0x12d   :  { %v146_v54 = vmul.f32 %v555_v53, %v142_v51 }
 0x12f   :  { %v150_v55 = vrot.slane %v146_v54, %v149_v52 }
 0x131   :  { %v151_v57 = vmul.f32 %v150_v55, %v133_v39  ;;  %v260_v39 = vld [vmem:[#allocation5] sm:$0x1] }
 0x133   :  { %v156_v58 = vadd.f32 %v381_v56, %v151_v57 }
 0x135   :  { %v157_v59 = vmax.f32 %v156_v58, 0.0 }
 0x137   :  { %460 = vmatmul.mubr.f32.vlgmr.msra.gmra.mrb[0].mxu1 %v157_v59 }
 0x20a   :  { %v240_v21 = vpop.f32.mrb[0].mxu1 }
 0x20b   :  { %v244_v22 = vrot.slane %v240_v21, 4  ;;  %v461_v23 = vpop.f32.mrb[1].mxu1 }
 0x20d   :  { %v245_v24 = vadd.f32 %v244_v22, %v240_v21 }
 0x20f   :  { %v246_v25 = vrot.slane %v245_v24, 2 }
 0x211   :  { %v247_v26 = vadd.f32 %v246_v25, %v245_v24 }
 0x213   :  { %v248_v27 = vrot.slane %v247_v26, 1 }
 0x215   :  { %v249_v28 = vadd.f32 %v248_v27, %v247_v26 }
 0x217   :  { %v250_v29 = vmul.f32 0.125, %v249_v28 }
 0x219   :  { %v251_v0 = vsub.f32 %v240_v21, %v250_v29 }
 0x21b   :  { %v252_v30 = vmul.f32 %v251_v0, %v251_v0 }
 0x21d   :  { %v253_v31 = vrot.slane %v252_v30, 4 }
 0x21f   :  { %v254_v32 = vadd.f32 %v253_v31, %v252_v30 }
 0x221   :  { %v255_v33 = vrot.slane %v254_v32, 2 }
 0x223   :  { %v256_v34 = vadd.f32 %v255_v33, %v254_v32 }
 0x225   :  { %v257_v35 = vrot.slane %v256_v34, 1 }
 0x227   :  { %v258_v36 = vadd.f32 %v257_v35, %v256_v34 }
 0x229   :  { %v259_v37 = vmul.f32 0.125, %v258_v36 }
 0x22b   :  { %v262_v38 = vadd.f32 1e-05, %v259_v37 }
 0x22d   :  { %556 = vrsqrt.f32 %v262_v38 }
 0x237   :  { %v557_v40 = vpop.eup %556 }
 0x238   :  { %v264_v41 = vmul.f32 %v557_v40, %v260_v39 }
 0x23a   :  { %v268_v42 = vrot.slane %v264_v41, %v149_v52 }
 0x23c   :  { %v269_v44 = vmul.f32 %v268_v42, %v251_v0 }
 0x23e   :  { %v274_v45 = vadd.f32 %v382_v43, %v269_v44 }
 0x240   :  { %v275_v46 = vmax.f32 %v274_v45, 0.0 }
 0x242   :  { %495 = vmatmul.mubr.f32.vlgmr.msra.gmra.mrb[2].mxu0 %v275_v46 }
 0x315   :  { %v358_v47 = vpop.f32.mrb[2].mxu0 }
 0x316   :  { %v496_v48 = vpop.f32.mrb[3].mxu0  ;;  %363 = vst.msk [vmem:[#allocation7] sm:$0xff] %vm362_vm2, %v358_v47 }
 0x317   :  { %613 = shalt.err (!%p610_p6)
}
 0x318   :  { %s614_s12 = scalar_lea.hbm %s845_s6, 128 }
 0x319   :  { %p615_p7 = scmp.ne.s32.totalorder %s845_s6, %s614_s12  ;;  %p618_p8 = scmp.lt.u32.totalorder %s614_s12, %s845_s6 }
 0x31b   :  { %p620_p9 = pnand %p618_p8, %p615_p7 }
 0x31d   :  { %623 = shalt.err (!%p620_p9)
}
 0x31e   :  { %373 = dma.vmem_to_hbm [thread:$0]  %s371_s9, 128, %s845_s6, [#allocation4]  }
 0x31f   :  { %628 = dma.done.wait [#allocation4], 128  }
 0x320   :  { %629 = vsyncadd [#allocation4], 4294967168 }
 0x321   :  { %377 = vsyncpa [#allocation3], 1 }
 0x322   :  { %378 = vsyncpa [#allocation6], 1 }
 0x323   :  { %379 = vsyncpa [#allocation4], 1 }

</bundles_post_ra>
